<compile_context>
chip_gen: v7x
topology: tpu7x:2x2x1
jax: 0.10.0
libtpu: 0.0.40
codegen_flags: <defaults>
</compile_context>

<pallas_src>
import functools

import numpy as np
import jax
import jax.numpy as jnp
from jax import lax
from jax.experimental import pallas as pl
from jax.experimental.pallas import tpu as pltpu


_CUMSUM_MATMUL_MAX_L = 256   # tri@V cumsum below this, log-step shift/add scan above


# ----------------------------- Kernel A: sparsity measure M ------------------
def _sparsity_measure_kernel(q_ref, k_ref, cnt_t_ref, m_ref):
    # q_ref: (G, L_Q, E) bf16   k_ref: (G, L_K, E) bf16
    # cnt_t_ref: (L_K, L_Q) bf16 sample multiplicities   m_ref: (G, 1, L_Q) f32
    G = q_ref.shape[0]
    L_K = k_ref.shape[1]

    cnt_t = cnt_t_ref[...].astype(jnp.float32)             # [L_K, L_Q]
    sampled = cnt_t > 0.0                                   # hoisted out of the g-loop
    inv_lk = jnp.float32(1.0 / L_K)
    neg = jnp.float32(-1e30)

    for g in range(G):                                      # static unroll, G <= 4
        # transposed scores: per-query reductions run along sublanes and the
        # output row [1, L_Q] is lane-dense.
        qk_t = lax.dot_general(k_ref[g], q_ref[g], (((1,), (1,)), ((), ())),
                               preferred_element_type=jnp.float32)        # [L_K, L_Q]
        samp_sum = jnp.sum(qk_t * cnt_t, axis=0, keepdims=True)           # [1, L_Q]
        samp_max = jnp.max(jnp.where(sampled, qk_t, neg),
                           axis=0, keepdims=True)                         # [1, L_Q]
        m_ref[g] = samp_max - samp_sum * inv_lk


# ----------------------------- Kernel B: main attention path -----------------
def _inclusive_cumsum_rows(x):
    # Hillis-Steele inclusive prefix sum along axis 0 (log2(L) shift+add steps).
    L, D = x.shape
    s = 1
    while s < L:
        shifted = jnp.concatenate(
            [jnp.zeros((s, D), x.dtype), x[:L - s, :]], axis=0)
        x = x + shifted
        s *= 2
    return x


def _prob_attn_kernel(idx_ref, q_ref, k_ref, v_ref, ctx_ref,
                      qred_scr, out_scr, ctx_scr, *, scale, mask_flag, u, u_pad):
    # idx_ref : SMEM (BH, u_pad) int32 scalar-prefetch (padded entries are 0; never stored back)
    # q_ref   : (G, L_Q, E) f32   (f32 so dynamic-sublane gather loads are 32-bit)
    # k_ref   : (G, L_K, E) bf16  v_ref: (G, L_V, D) bf16
    # ctx_ref : (L_Q, G*D) f32    lane-dense output block; head g owns lanes [g*D:(g+1)*D]
    # qred_scr: (u_pad, E) f32    out_scr: (u_pad, D) f32   ctx_scr: (L_Q, D) f32
    G, L_Q, E = q_ref.shape
    L_K = k_ref.shape[1]
    L_V, D = v_ref.shape[1], v_ref.shape[2]

    step = pl.program_id(0)
    NEG = jnp.float32(-1e30)
    scale_f = jnp.float32(scale)

    if mask_flag:
        col_k = lax.broadcasted_iota(jnp.int32, (u_pad, L_K), 1)
        row_u = lax.broadcasted_iota(jnp.int32, (u_pad, 1), 0)
        use_tri = L_V <= _CUMSUM_MATMUL_MAX_L
        if use_tri:
            # lower-triangular (inclusive) bf16 matrix, built once per grid step
            # and shared by all G heads (exact 0/1 values).
            tri = (lax.broadcasted_iota(jnp.int32, (L_V, L_V), 1)
                   <= lax.broadcasted_iota(jnp.int32, (L_V, L_V), 0)).astype(jnp.bfloat16)

    for g in range(G):                                      # static unroll, G <= 4
        bh = step * G + g
        k = k_ref[g]                                        # [L_K, E] bf16
        v = v_ref[g]                                        # [L_V, D] bf16

        # top-u indices as SMEM scalars (padded entries read row 0, never written back).
        its = [idx_ref[bh, t] for t in range(u_pad)]

        # ---- gather the selected query rows via dynamic-sublane loads ----
        for t in range(u_pad):
            qred_scr[pl.ds(t, 1), :] = q_ref[g, pl.ds(its[t], 1), :]
        q_red = qred_scr[...].astype(jnp.bfloat16)          # [u_pad, E]

        # scores = Q_reduce @ K^T * scale  (bf16 MXU, f32 accumulation)
        scores = lax.dot_general(q_red, k, (((1,), (1,)), ((), ())),
                                 preferred_element_type=jnp.float32) * scale_f

        if mask_flag:
            # idx column rebuilt from the SMEM scalars (tiny VPU selects, no VMEM tile).
            idx_col = jnp.zeros((u_pad, 1), jnp.int32)
            for t in range(u_pad):
                idx_col = jnp.where(row_u == t, its[t], idx_col)
            scores = jnp.where(col_k <= idx_col, scores, NEG)   # ProbMask, pure VPU
            if use_tri:
                ctx0 = lax.dot_general(tri, v, (((1,), (0,)), ((), ())),
                                       preferred_element_type=jnp.float32)   # cumsum(V)
            else:
                ctx0 = _inclusive_cumsum_rows(v.astype(jnp.float32))
        else:
            v_mean = jnp.mean(v.astype(jnp.float32), axis=0, keepdims=True)  # [1, D]
            ctx0 = jnp.broadcast_to(v_mean, (L_Q, D))

        # softmax over keys in f32; divide moved to the EUP.
        s_max = jnp.max(scores, axis=-1, keepdims=True)
        p = jnp.exp(scores - s_max)
        denom = jnp.sum(p, axis=-1, keepdims=True)
        attn = p * pl.reciprocal(denom, approx=True)        # [u_pad, L_K]

        out = lax.dot_general(attn.astype(jnp.bfloat16), v, (((1,), (0,)), ((), ())),
                              preferred_element_type=jnp.float32)            # [u_pad, D]

        # ---- scatter: overwrite the u selected rows with direct dynamic stores ----
        ctx_scr[...] = ctx0
        out_scr[...] = out
        for t in range(u):                                  # u is static; padded rows skipped
            ctx_scr[pl.ds(its[t], 1), :] = out_scr[pl.ds(t, 1), :]
        # lane-dense packing: head g occupies lanes [g*D:(g+1)*D] of the output block.
        ctx_ref[:, pl.ds(g * D, D)] = ctx_scr[...]


# ----------------------------- helpers ---------------------------------------
def _vmem_capacity_bytes():
    try:
        return int(pltpu.get_tpu_info().vmem_capacity_bytes)
    except Exception:
        return 64 * 1024 * 1024    # conservative (v7x per-core VMEM)


def _pick_group(bh, per_head_bytes, shared_bytes, budget, prefer_multiple=1, max_g=4):
    """Pick how many heads to block per grid step.

    Constraints: divides B*H, unroll bound <= max_g (vreg live ranges), fits the VMEM
    budget.  Preference order: lane-dense multiples (prefer_multiple), >= 2 grid steps
    (pipelining / multi-TC), then largest."""
    feasible = [g for g in range(1, min(bh, max_g) + 1)
                if bh % g == 0 and shared_bytes + g * per_head_bytes <= budget]
    if not feasible:
        return 1
    preferred = [g for g in feasible if g % prefer_multiple == 0] or feasible
    multi = [g for g in preferred if bh // g >= 2] or preferred
    return max(multi)


# ----------------------------- Wrapper ----------------------------------------
def prob_attention(queries, keys, values, sample_key, *, factor=5, scale=None,
                   mask_flag=True):
    """ProbAttention.forward.  Returns (context [B, H, L_Q, D], None)."""
    B, L_Q, H, E = queries.shape
    _, L_K, _, _ = keys.shape
    _, L_V, _, D = values.shape
    BH = B * H

    # [B, L, H, E] -> [B*H, L, E].  Q kept in f32 for kernel B (32-bit gather path);
    # bf16 copies feed every MXU matmul.
    q_f32 = jnp.transpose(queries, (0, 2, 1, 3)).reshape(BH, L_Q, E).astype(jnp.float32)
    q_bf = q_f32.astype(jnp.bfloat16)
    k_bf = jnp.transpose(keys, (0, 2, 1, 3)).reshape(BH, L_K, E).astype(jnp.bfloat16)
    v_bf = jnp.transpose(values, (0, 2, 1, 3)).reshape(BH, L_V, D).astype(jnp.bfloat16)

    U_part = min(int(factor * np.ceil(np.log(L_K))), L_K)
    u = min(int(factor * np.ceil(np.log(L_Q))), L_Q)
    if mask_flag:
        assert L_Q == L_V

    # random key-sampling indices, shared across (B, H), like torch.randint.
    index_sample = jax.random.randint(sample_key, (L_Q, U_part), 0, L_K)
    # counts_t[k, i] = #{j : index_sample[i, j] == k}, via scatter-add (no O(LK*LQ*U) compare).
    q_ids = jnp.broadcast_to(jnp.arange(L_Q, dtype=jnp.int32)[:, None], (L_Q, U_part))
    counts_t = (jnp.zeros((L_K, L_Q), jnp.float32)
                .at[index_sample.reshape(-1), q_ids.reshape(-1)].add(1.0)
                ).astype(jnp.bfloat16)                                     # [L_K, L_Q]

    # generation-aware VMEM budgets; scoped limit set explicitly on both kernels.
    vmem_cap = _vmem_capacity_bytes()
    vmem_limit = int(vmem_cap * 0.7)
    budget = int(vmem_limit * 0.8)

    # --- kernel A: per-query sparsity measure M (lane-dense [*, 1, L_Q] output) ---
    a_shared = 2 * (L_K * L_Q * 2)                         # counts_t bf16, double-buffered
    a_per_head = (2 * (L_Q * E * 2 + L_K * E * 2)          # q, k bf16, double-buffered
                  + 2 * (L_Q * 4)                          # M out f32, double-buffered
                  + L_K * L_Q * 4)                         # qk_t f32 live intermediate
    G_A = _pick_group(BH, a_per_head, a_shared, budget, prefer_multiple=1, max_g=4)

    m = pl.pallas_call(
        _sparsity_measure_kernel,
        out_shape=jax.ShapeDtypeStruct((BH, 1, L_Q), jnp.float32),
        grid=(BH // G_A,),
        in_specs=[
            pl.BlockSpec((G_A, L_Q, E), lambda i: (i, 0, 0)),
            pl.BlockSpec((G_A, L_K, E), lambda i: (i, 0, 0)),
            pl.BlockSpec((L_K, L_Q), lambda i: (0, 0)),
        ],
        out_specs=pl.BlockSpec((G_A, 1, L_Q), lambda i: (i, 0, 0)),
        compiler_params=pltpu.CompilerParams(
            dimension_semantics=("parallel",), vmem_limit_bytes=vmem_limit),
    )(q_bf, k_bf, counts_t)

    # top-u query selection (torch.topk equivalent) — plain-JAX glue.
    # TODO(synk): on memory-bound v5e workloads this could be fused into kernel B
    # (iterative in-kernel argmax over M) to avoid streaming Q/K from HBM twice.
    _, index = lax.top_k(m[:, 0, :], u)                                    # [BH, u]
    index = index.astype(jnp.int32)
    # pad u to a sublane multiple with index 0 (valid); padded rows are never stored back.
    u_pad = ((u + 7) // 8) * 8
    idx_pad = jnp.concatenate(
        [index, jnp.zeros((BH, u_pad - u), jnp.int32)], axis=1)            # [BH, u_pad]

    scale_val = float(scale) if scale is not None else 1.0 / float(np.sqrt(E))

    # --- kernel B: scores, ProbMask, softmax, attn@V, cumsum context, scatter ----
    lane_mult = (128 // D) if (D <= 128 and 128 % D == 0) else 1
    use_tri = mask_flag and (L_V <= _CUMSUM_MATMUL_MAX_L)
    b_shared = ((L_V * L_V * 2 if use_tri else 0)                          # tri (once per step)
                + u_pad * E * 4 + u_pad * D * 4 + L_Q * D * 4)             # scratches
    b_per_head = (2 * (L_Q * E * 4 + L_K * E * 2 + L_V * D * 2)            # q f32 + k,v bf16, dbuf
                  + 2 * (L_Q * D * 4)                                      # ctx out f32, dbuf
                  + 2 * (u_pad * L_K * 4) + L_V * D * 4)                   # scores/attn + ctx0 live
    G_B = _pick_group(BH, b_per_head, b_shared, budget,
                      prefer_multiple=min(lane_mult, 4), max_g=4)

    ctx = pl.pallas_call(
        functools.partial(_prob_attn_kernel, scale=scale_val, mask_flag=mask_flag,
                          u=u, u_pad=u_pad),
        out_shape=jax.ShapeDtypeStruct((BH // G_B, L_Q, G_B * D), jnp.float32),
        grid_spec=pltpu.PrefetchScalarGridSpec(
            num_scalar_prefetch=1,                       # idx -> SMEM scalars
            grid=(BH // G_B,),
            in_specs=[
                pl.BlockSpec((G_B, L_Q, E), lambda i, idx: (i, 0, 0)),
                pl.BlockSpec((G_B, L_K, E), lambda i, idx: (i, 0, 0)),
                pl.BlockSpec((G_B, L_V, D), lambda i, idx: (i, 0, 0)),
            ],
            out_specs=pl.BlockSpec((None, L_Q, G_B * D), lambda i, idx: (i, 0, 0)),
            scratch_shapes=[
                pltpu.VMEM((u_pad, E), jnp.float32),     # gathered Q rows
                pltpu.VMEM((u_pad, D), jnp.float32),     # attn @ V rows
                pltpu.VMEM((L_Q, D), jnp.float32),       # per-head context assembly
            ]),
        compiler_params=pltpu.CompilerParams(
            dimension_semantics=("parallel",), vmem_limit_bytes=vmem_limit),
    )(idx_pad, q_f32, k_bf, v_bf)

    # un-pack the lane-dense output: (BH//G, L_Q, G*D) -> (B, H, L_Q, D)
    ctx = ctx.reshape(BH // G_B, L_Q, G_B, D)
    ctx = jnp.transpose(ctx, (0, 2, 1, 3)).reshape(B, H, L_Q, D)
    # output_attention=False in the reference default -> attn is None.
    return ctx, None


# ----------------------------- Pure-JAX reference -----------------------------
# Mirrors the PyTorch algorithm with the same bf16-operand / f32-accumulation
# precision policy as the kernels (so the top-u selection is identical).
def prob_attention_ref(queries, keys, values, sample_key, *, factor=5, scale=None,
                       mask_flag=True):
    B, L_Q, H, D = queries.shape
    _, L_K, _, _ = keys.shape
    q = jnp.transpose(queries, (0, 2, 1, 3)).astype(jnp.bfloat16)
    k = jnp.transpose(keys, (0, 2, 1, 3)).astype(jnp.bfloat16)
    v = jnp.transpose(values, (0, 2, 1, 3)).astype(jnp.bfloat16)

    U_part = min(int(factor * np.ceil(np.log(L_K))), L_K)
    u = min(int(factor * np.ceil(np.log(L_Q))), L_Q)

    index_sample = jax.random.randint(sample_key, (L_Q, U_part), 0, L_K)
    K_sample = k[:, :, index_sample, :]                                   # [B,H,L_Q,U,D]
    QK_sample = jnp.einsum('bhqd,bhqsd->bhqs', q, K_sample,
                           preferred_element_type=jnp.float32)
    M = QK_sample.max(-1) - QK_sample.sum(-1) / L_K
    _, index = lax.top_k(M, u)                                            # [B,H,u]

    q_red = jnp.take_along_axis(q, index[..., None], axis=2)              # [B,H,u,D]
    scores = jnp.einsum('bhud,bhkd->bhuk', q_red, k,
                        preferred_element_type=jnp.float32)
    scale_val = float(scale) if scale is not None else 1.0 / float(np.sqrt(D))
    scores = scores * scale_val

    if mask_flag:
        cols = jnp.arange(L_K)[None, None, None, :]
        scores = jnp.where(cols > index[..., None], -jnp.inf, scores)
        ctx = jnp.cumsum(v.astype(jnp.float32), axis=2)
    else:
        ctx = jnp.broadcast_to(v.astype(jnp.float32).mean(axis=2, keepdims=True),
                               (B, H, L_Q, D))

    attn = jax.nn.softmax(scores, axis=-1)
    out = jnp.einsum('bhuk,bhkd->bhud', attn.astype(jnp.bfloat16), v,
                     preferred_element_type=jnp.float32)
    bidx = jnp.arange(B)[:, None, None]
    hidx = jnp.arange(H)[None, :, None]
    ctx = ctx.at[bidx, hidx, index].set(out)
    return ctx


if __name__ == "__main__":
    B, L, H, D = 2, 64, 2, 32          # L_Q = L_K = L_V = 64
    key = jax.random.PRNGKey(0)
    kq, kk, kv, ks = jax.random.split(key, 4)
    queries = jax.random.normal(kq, (B, L, H, D), dtype=jnp.float32)
    keys_ = jax.random.normal(kk, (B, L, H, D), dtype=jnp.float32)
    values = jax.random.normal(kv, (B, L, H, D), dtype=jnp.float32)

    # TODO(synk): nn.Dropout is defined in __init__ but never applied in forward;
    # output_attention=False path implemented (attn output is None).
    for mf in (True, False):
        ctx, attn = prob_attention(queries, keys_, values, ks,
                                   factor=5, scale=None, mask_flag=mf)
        ctx = jax.block_until_ready(ctx)
        ref = prob_attention_ref(queries, keys_, values, ks,
                                 factor=5, scale=None, mask_flag=mf)
        np.testing.assert_allclose(np.asarray(ctx), np.asarray(ref),
                                   rtol=5e-3, atol=5e-3)
        assert ctx.shape == (B, H, L, D) and attn is None
    print("KERNEL_OK")
</pallas_src>

<mosaic_0001>
module attributes {stable_mosaic.version = 11 : i64} {
  func.func @_sparsity_measure_kernel(%arg0: i32, %arg1: memref<2x64x32xbf16, #tpu.memory_space<vmem>>, %arg2: memref<2x64x32xbf16, #tpu.memory_space<vmem>>, %arg3: memref<64x64xbf16, #tpu.memory_space<vmem>>, %arg4: memref<2x1x64xf32, #tpu.memory_space<vmem>>) attributes {dimension_semantics = [#tpu.dimension_semantics<parallel>], iteration_bounds = array<i64: 2>, scalar_prefetch = 0 : i64, scratch_operands = 0 : i64, tpu.core_type = #tpu.core_type<tc>, window_params = [{transform_indices = @transform_0, window_bounds = array<i64: 2, 64, 32>}, {transform_indices = @transform_1, window_bounds = array<i64: 2, 64, 32>}, {pipeline_mode = #tpu.pipeline_mode<synchronous>, transform_indices = @transform_2, window_bounds = array<i64: 64, 64>}, {transform_indices = @transform_3, window_bounds = array<i64: 2, 1, 64>}]} {
    %c0 = arith.constant 0 : index
    %c0_0 = arith.constant 0 : index
    %0 = vector.load %arg3[%c0, %c0_0] : memref<64x64xbf16, #tpu.memory_space<vmem>>, vector<64x64xbf16>
    %1 = arith.extf %0 : vector<64x64xbf16> to vector<64x64xf32>
    %cst = arith.constant 0.000000e+00 : f32
    %2 = vector.broadcast %cst : f32 to vector<64x64xf32>
    %3 = arith.cmpf ogt, %1, %2 : vector<64x64xf32>
    %c0_1 = arith.constant 0 : index
    %c0_2 = arith.constant 0 : index
    %c0_3 = arith.constant 0 : index
    %4 = vector.load %arg2[%c0_1, %c0_2, %c0_3] : memref<2x64x32xbf16, #tpu.memory_space<vmem>>, vector<1x64x32xbf16>
    %5 = vector.shape_cast %4 : vector<1x64x32xbf16> to vector<64x32xbf16>
    %c0_4 = arith.constant 0 : index
    %c0_5 = arith.constant 0 : index
    %c0_6 = arith.constant 0 : index
    %6 = vector.load %arg1[%c0_4, %c0_5, %c0_6] : memref<2x64x32xbf16, #tpu.memory_space<vmem>>, vector<1x64x32xbf16>
    %7 = vector.shape_cast %6 : vector<1x64x32xbf16> to vector<64x32xbf16>
    %cst_7 = arith.constant dense<0.000000e+00> : vector<64x64xf32>
    %8 = tpu.matmul %5, %7, %cst_7 {dimension_numbers = #tpu.dot_dimension_numbers<[1], [1], [0], [0], [0, 0, 1, 0], [], []>} : vector<64x32xbf16>, vector<64x32xbf16>, vector<64x64xf32> -> vector<64x64xf32>
    %9 = arith.mulf %8, %1 : vector<64x64xf32>
    %cst_8 = arith.constant dense<0.000000e+00> : vector<64xf32>
    %10 = vector.multi_reduction <add>, %9, %cst_8 [0] : vector<64x64xf32> to vector<64xf32>
    %11 = vector.shape_cast %10 : vector<64xf32> to vector<1x64xf32>
    %cst_9 = arith.constant -1.000000e+30 : f32
    %12 = vector.broadcast %cst_9 : f32 to vector<64x64xf32>
    %13 = arith.select %3, %8, %12 : vector<64x64xi1>, vector<64x64xf32>
    %cst_10 = arith.constant dense<0xFF800000> : vector<64xf32>
    %14 = vector.multi_reduction <maximumf>, %13, %cst_10 [0] : vector<64x64xf32> to vector<64xf32>
    %15 = vector.shape_cast %14 : vector<64xf32> to vector<1x64xf32>
    %cst_11 = arith.constant 1.562500e-02 : f32
    %16 = vector.broadcast %cst_11 : f32 to vector<1x64xf32>
    %17 = arith.mulf %11, %16 : vector<1x64xf32>
    %18 = arith.subf %15, %17 : vector<1x64xf32>
    %c0_12 = arith.constant 0 : index
    %c0_13 = arith.constant 0 : index
    %c0_14 = arith.constant 0 : index
    %19 = vector.load %arg4[%c0_12, %c0_13, %c0_14] : memref<2x1x64xf32, #tpu.memory_space<vmem>>, vector<1x1x64xf32>
    %20 = vector.shape_cast %19 : vector<1x1x64xf32> to vector<1x64xf32>
    %21 = vector.shape_cast %18 : vector<1x64xf32> to vector<1x1x64xf32>
    tpu.vector_store %arg4[%c0_12, %c0_13, %c0_14], %21 {strides = array<i32>} : memref<2x1x64xf32, #tpu.memory_space<vmem>>, vector<1x1x64xf32>,
    %c1 = arith.constant 1 : index
    %c0_15 = arith.constant 0 : index
    %c0_16 = arith.constant 0 : index
    %22 = vector.load %arg2[%c1, %c0_15, %c0_16] : memref<2x64x32xbf16, #tpu.memory_space<vmem>>, vector<1x64x32xbf16>
    %23 = vector.shape_cast %22 : vector<1x64x32xbf16> to vector<64x32xbf16>
    %c1_17 = arith.constant 1 : index
    %c0_18 = arith.constant 0 : index
    %c0_19 = arith.constant 0 : index
    %24 = vector.load %arg1[%c1_17, %c0_18, %c0_19] : memref<2x64x32xbf16, #tpu.memory_space<vmem>>, vector<1x64x32xbf16>
    %25 = vector.shape_cast %24 : vector<1x64x32xbf16> to vector<64x32xbf16>
    %cst_20 = arith.constant dense<0.000000e+00> : vector<64x64xf32>
    %26 = tpu.matmul %23, %25, %cst_20 {dimension_numbers = #tpu.dot_dimension_numbers<[1], [1], [0], [0], [0, 0, 1, 0], [], []>} : vector<64x32xbf16>, vector<64x32xbf16>, vector<64x64xf32> -> vector<64x64xf32>
    %27 = arith.mulf %26, %1 : vector<64x64xf32>
    %cst_21 = arith.constant dense<0.000000e+00> : vector<64xf32>
    %28 = vector.multi_reduction <add>, %27, %cst_21 [0] : vector<64x64xf32> to vector<64xf32>
    %29 = vector.shape_cast %28 : vector<64xf32> to vector<1x64xf32>
    %cst_22 = arith.constant -1.000000e+30 : f32
    %30 = vector.broadcast %cst_22 : f32 to vector<64x64xf32>
    %31 = arith.select %3, %26, %30 : vector<64x64xi1>, vector<64x64xf32>
    %cst_23 = arith.constant dense<0xFF800000> : vector<64xf32>
    %32 = vector.multi_reduction <maximumf>, %31, %cst_23 [0] : vector<64x64xf32> to vector<64xf32>
    %33 = vector.shape_cast %32 : vector<64xf32> to vector<1x64xf32>
    %cst_24 = arith.constant 1.562500e-02 : f32
    %34 = vector.broadcast %cst_24 : f32 to vector<1x64xf32>
    %35 = arith.mulf %29, %34 : vector<1x64xf32>
    %36 = arith.subf %33, %35 : vector<1x64xf32>
    %c1_25 = arith.constant 1 : index
    %c0_26 = arith.constant 0 : index
    %c0_27 = arith.constant 0 : index
    %37 = vector.load %arg4[%c1_25, %c0_26, %c0_27] : memref<2x1x64xf32, #tpu.memory_space<vmem>>, vector<1x1x64xf32>
    %38 = vector.shape_cast %37 : vector<1x1x64xf32> to vector<1x64xf32>
    %39 = vector.shape_cast %36 : vector<1x64xf32> to vector<1x1x64xf32>
    tpu.vector_store %arg4[%c1_25, %c0_26, %c0_27], %39 {strides = array<i32>} : memref<2x1x64xf32, #tpu.memory_space<vmem>>, vector<1x1x64xf32>,
    return
  }
  func.func @transform_0(%arg0: i32) -> (i32, i32, i32) {
    %c0_i32 = arith.constant 0 : i32
    %c0_i32_0 = arith.constant 0 : i32
    %c0_i32_1 = arith.constant 0 : i32
    return %arg0, %c0_i32, %c0_i32_0 : i32, i32, i32
  }
  func.func @transform_1(%arg0: i32) -> (i32, i32, i32) {
    %c0_i32 = arith.constant 0 : i32
    %c0_i32_0 = arith.constant 0 : i32
    %c0_i32_1 = arith.constant 0 : i32
    return %arg0, %c0_i32, %c0_i32_0 : i32, i32, i32
  }
  func.func @transform_2(%arg0: i32) -> (i32, i32) {
    %c0_i32 = arith.constant 0 : i32
    %c0_i32_0 = arith.constant 0 : i32
    %c0_i32_1 = arith.constant 0 : i32
    return %c0_i32, %c0_i32_0 : i32, i32
  }
  func.func @transform_3(%arg0: i32) -> (i32, i32, i32) {
    %c0_i32 = arith.constant 0 : i32
    %c0_i32_0 = arith.constant 0 : i32
    %c0_i32_1 = arith.constant 0 : i32
    return %arg0, %c0_i32, %c0_i32_0 : i32, i32, i32
  }
}

</mosaic_0001>

<bundles_post_ra>
// kernel: tpu_custom_call.1
= control target key start
LH: loop header
LB: loop body
LE: loop exit
PB: predicated region body
PF: predicated region fallthrough
CT: control target
= control target key end

     0   :  { %8 = vsyncpa [#allocation3], 0  ;;  %s1258_s0 = inlined_call_operand.vmem [shape: bf16[4,64,32], index: 0, kind: input, shape index: {}]   ;;  %s1259_s1 = inlined_call_operand.vmem [shape: bf16[4,64,32], index: 1, kind: input, shape index: {}]   ;;  %s1260_s2 = inlined_call_operand.vmem [shape: bf16[64,64], index: 2, kind: input, shape index: {}]   ;;  %s1261_s3 = inlined_call_operand.hbm [shape: f32[4,1,64], index: 3, kind: output, shape index: {}]  }
   0x1   :  { %10 = vsyncpa [#allocation3 + $0x1], 0  ;;  %s1010_s12 = smov 0   ;;  %s1012_s13 = smov 0  }
   0x2   :  { %s1014_s14 = smov 0   ;;  %s1016_s15 = smov 0  }
   0x3 LB: > { %s1031_s16 = sadd.s32 4294967295, %s985_s15   ;;  %s731_s17 = sadd.s32 4294967294, %s985_s15   ;;  %s985_s15 = sphi %s1016_s15, %s1267_s15   ;;  %s981_s14 = sphi %s1014_s14, %s1266_s14   ;;  %s977_s13 = sphi %s1012_s13, %s1265_s13   ;;  %s973_s12 = sphi %s1010_s12, %s1264_s12  }
   0x4   : > { %s1035_s18 = sadd.s32 1, %s985_s15   ;;  %s96_s19 = sadd.s32 1, %s981_s14 }
   0x5   : > { %s93_s20 = ssub.s32 %s985_s15, %s1035_s18  ;;  %p106_p0 = scmp.ne.s32.totalorder %s981_s14, %s977_s13 }
   0x6   : > { %p94_p1 = scmp.eq.s32.totalorder %s93_s20, 0  ;;  %p107_p2 = scmp.eq.s32.totalorder %s1031_s16, 1 }
   0x7   : > { %p112_p3 = scmp.ne.s32.totalorder %s977_s13, %s973_s12  ;;  %p113_p4 = scmp.eq.s32.totalorder %s731_s17, 1 }
   0x8   : > { %s1046_s21 = scalar_select %p94_p1, %s981_s14, %s96_s19  }
   0x9   : > { %p1048_p5 = por %p107_p2, %p106_p0  ;;  %p1052_p6 = por %p113_p4, %p112_p3 }
   0xa   : > { %p734_p7 = scmp.ge.s32.totalorder %s985_s15, 1  ;;  %p154_p8 = scmp.lt.s32.totalorder %s985_s15, 3 }
   0xc   : > { %p155_p9 = pnand %p734_p7, %p154_p8 }
   0xd   : > { %s736_s24 = sshll.u32 (!%p155_p9), %s1031_s16, 1  ;;  %vm281_vm0 = vcmask (!%p155_p9), 261120   ;;  %v807_v24 = vld [vmem:[%s1260_s2 + $0x8] sm:$0xff] (!%p155_p9)   ;;  %v792_v25 = vld [vmem:[%s1260_s2] sm:$0xff] (!%p155_p9)   ;;  %v809_v27 = vld [vmem:[%s1260_s2 + $0x18] sm:$0xff] (!%p155_p9)   ;;  %vm379_vm2 = vcmask (!%p155_p9), 523264  }
   0xe   : > { %158 = sbr.rel (%p155_p9) target bundleno = 325 (0x145), region = 32  ;;  %p186_p10 = scmp.lt.s32.totalorder (!%p155_p9), %s736_s24, 3  ;;  %v797_v26 = vunpack.c.l.bf16 (!%p155_p9), %v807_v24  ;;  %v793_v28 = vunpack.c.l.bf16 (!%p155_p9), %v792_v25  ;;  %v798_v29 = vunpack.c.h.bf16 (!%p155_p9), %v807_v24  ;;  %v808_v30 = vld [vmem:[%s1260_s2 + $0x10] sm:$0xff] (!%p155_p9)   ;;  %v1111_v31 = vunpack.c.h.bf16 (!%p155_p9), %v792_v25 }
   0xf   : > { %v1113_v32 = vunpack.c.l.bf16 (!%p155_p9), %v809_v27  ;;  %v1115_v33 = vunpack.c.l.bf16 (!%p155_p9), %v808_v30  ;;  %v1119_v44 = vunpack.c.h.bf16 (!%p155_p9), %v809_v27  ;;  %v1123_v49 = vunpack.c.h.bf16 (!%p155_p9), %v808_v30  ;;  %s182_s19 = sand.u32 (!%p155_p9), 1, %s977_s13  }
  0x10   : > { %vm219_vm1 = vcmp.gt.f32.partialorder (!%p155_p9), %v797_v26, 0.0  ;;  %vm217_vm3 = vcmp.gt.f32.partialorder (!%p155_p9), %v793_v28, 0.0  ;;  %vm220_vm4 = vcmp.gt.f32.partialorder (!%p155_p9), %v798_v29, 0.0  ;;  %vm218_vm5 = vcmp.gt.f32.partialorder (!%p155_p9), %v1111_v31, 0.0  ;;  %s735_s20 = sshll.u32 (!%p155_p9), %s182_s19, 1 }
  0x11   : > { %vm223_vm6 = vcmp.gt.f32.partialorder (!%p155_p9), %v1113_v32, 0.0  ;;  %vm221_vm7 = vcmp.gt.f32.partialorder (!%p155_p9), %v1115_v33, 0.0  ;;  %vm224_vm8 = vcmp.gt.f32.partialorder (!%p155_p9), %v1119_v44, 0.0  ;;  %vm222_vm9 = vcmp.gt.f32.partialorder (!%p155_p9), %v1123_v49, 0.0 }
  0x12   : > { %vm432_vm10 = vcmask (!%p155_p9), 516096  }
  0x15   : > { %s1269_s24 = smov (!%p186_p10, %s736_s24), 3 }
  0x16   : > { %s788_s25 = sshll.u32 %s1269_s24, 5  ;;  %s790_s24 = sshll.u32 %s1031_s16, 5 }
  0x17   : > { %s190_s28 = scalar_lea.vmem %s1258_s0, %s788_s25  ;;  %s1071_s4 = scalar_lea.vmem %s1259_s1, %s788_s25 }
  0x18   : > { %v907_v0 = vld [vmem:[%s190_s28] sm:$0xff]   ;;  %v909_v3 = vld [vmem:[%s190_s28 + $0x8] sm:$0xff]   ;;  %v911_v6 = vld [vmem:[%s190_s28 + $0x10] sm:$0xff]   ;;  %s184_s25 = scalar_lea.vmem [#allocation2], %s735_s20  ;;  %s1211_s29 = scalar_lea.hbm %s1261_s3, %s790_s24 }
  0x19   : > { %v908_v1 = vld [vmem:[%s190_s28 + $0x20] sm:$0xff]   ;;  %858 = vmatprep.subr.msk.bf16.mxu0 %vm281_vm0, %v907_v0  ;;  %v295_v2 = vsel %vm281_vm0, %v907_v0, 0  ;;  %v910_v5 = vld [vmem:[%s190_s28 + $0x28] sm:$0xff]   ;;  %v912_v7 = vld [vmem:[%s190_s28 + $0x30] sm:$0xff]   ;;  %v298_v8 = vsel %vm281_vm0, %v909_v3, 0  ;;  %v301_v12 = vsel %vm281_vm0, %v911_v6, 0 }
  0x1a   : > { %862 = vmatprep.subr.msk.bf16.mxu1 %vm281_vm0, %v908_v1  ;;  %827 = vmatpush3.bf16.xpose.msra.mxu0 %v295_v2  ;;  %v505_v4 = vsel %vm281_vm0, %v908_v1, 0  ;;  %v915_v9 = vld [vmem:[%s1071_s4] sm:$0xff]   ;;  %v508_v10 = vsel %vm281_vm0, %v910_v5, 0  ;;  %v913_v13 = vld [vmem:[%s190_s28 + $0x18] sm:$0xff]   ;;  %v511_v14 = vsel %vm281_vm0, %v912_v7, 0  ;;  %v917_v18 = vld [vmem:[%s1071_s4 + $0x8] sm:$0xff]  }
  0x1b   : > { %843 = vmatpush3.bf16.xpose.msra.mxu1 %v505_v4  ;;  %859 = vmatprep.subr.msk.bf16.mxu0 %vm281_vm0, %v909_v3  ;;  %v916_v11 = vld [vmem:[%s1071_s4 + $0x20] sm:$0xff]   ;;  %v914_v15 = vld [vmem:[%s190_s28 + $0x38] sm:$0xff]   ;;  %v304_v16 = vsel %vm281_vm0, %v913_v13, 0  ;;  %v918_v19 = vld [vmem:[%s1071_s4 + $0x28] sm:$0xff]   ;;  %s657_s26 = sshll.u32 %s184_s25, 4  ;;  %s1217_s16 = scalar_lea.sflag [#allocation3], %s182_s19  ;;  %s1213_s26 = int_to_ptr.vmem [resolvable:$true] %s657_s26 }
  0x1c   : > { %863 = vmatprep.subr.msk.bf16.mxu1 %vm281_vm0, %v910_v5  ;;  %834 = vmatprep.mubr.msk.bf16.mxu0 %vm281_vm0, %v915_v9  ;;  %v514_v17 = vsel %vm281_vm0, %v914_v15, 0  ;;  %v919_v20 = vld [vmem:[%s1071_s4 + $0x10] sm:$0xff]   ;;  %v921_v22 = vld [vmem:[%s1071_s4 + $0x18] sm:$0xff]   ;;  %s923_s30 = scalar_lea.vmem %s1213_s26, 32 }
  0x1d   : > { %850 = vmatprep.mubr.msk.bf16.mxu1 %vm281_vm0, %v916_v11  ;;  %v920_v21 = vld [vmem:[%s1071_s4 + $0x30] sm:$0xff]   ;;  %v922_v23 = vld [vmem:[%s1071_s4 + $0x38] sm:$0xff]   ;;  %p924_p11 = scmp.ne.s32.totalorder %s1213_s26, %s923_s30  ;;  %s987_s4 = smov [#allocation2]  }
  0x1e   : > { %s927_s5 = sshll.u32 %s987_s4, 4  ;;  %s928_s5 = int_to_ptr.vmem [resolvable:$false] %s927_s5 }
  0x1f   : > { %p925_p12 = pnand %p924_p11, %p1048_p5  ;;  %s929_s6 = scalar_lea.vmem %s928_s5, 64 }
  0x20   : > { %p930_p0 = scmp.lt.s32.totalorder %s1213_s26, %s928_s5  ;;  %p931_p1 = scmp.lt.s32.totalorder %s929_s6, %s923_s30 }
  0x21   : > { %p926_p13 = pneg %p925_p12 }
  0x22   : > { %829 = vmatpush3.bf16.xpose.msra.mxu0 %v298_v8  ;;  %p932_p2 = por %p931_p1, %p930_p0 }
  0x23   : > { %845 = vmatpush3.bf16.xpose.msra.mxu1 %v508_v10  ;;  %860 = vmatprep.subr.msk.bf16.mxu0 %vm281_vm0, %v911_v6 }
  0x24   : > { %864 = vmatprep.subr.msk.bf16.mxu1 %vm281_vm0, %v912_v7  ;;  %p933_p3 = pnand %p932_p2, %p926_p13 }
  0x2a   : > { %831 = vmatpush3.bf16.xpose.msra.mxu0 %v301_v12 }
  0x2b   : > { %847 = vmatpush3.bf16.xpose.msra.mxu1 %v511_v14  ;;  %861 = vmatprep.subr.msk.bf16.mxu0 %vm281_vm0, %v913_v13 }
  0x2c   : > { %865 = vmatprep.subr.msk.bf16.mxu1 %vm281_vm0, %v914_v15 }
  0x32   : > { %833 = vmatpush3.bf16.xpose.msra.mxu0 %v304_v16 }
  0x33   : > { %849 = vmatpush3.bf16.xpose.msra.mxu1 %v514_v17 }
  0x39   : > { %835 = vmatmul.mubr.msk.bf16.vlgmr.msra.gmra.mrb[0].mxu0 %vm281_vm0, %v917_v18 }
  0x3a   : > { %851 = vmatmul.mubr.msk.bf16.vlgmr.msra.gmra.mrb[0].mxu1 %vm281_vm0, %v918_v19  ;;  %838 = vmatprep.mubr.msk.bf16.mxu0 %vm281_vm0, %v919_v20 }
  0x3b   : > { %854 = vmatprep.mubr.msk.bf16.mxu1 %vm281_vm0, %v920_v21 }
  0x41   : > { %839 = vmatmul.mubr.msk.bf16.gmra.mrb[4].mxu0 %vm281_vm0, %v921_v22 }
  0x42   : > { %855 = vmatmul.mubr.msk.bf16.gmra.mrb[4].mxu1 %vm281_vm0, %v922_v23 }
 0x10c   : > { %v836_v34 = vpop.f32.mrb[0].mxu0 }
 0x10d   : > { %v373_v35 = vmul.f32 %v836_v34, %v797_v26  ;;  %v403_v36 = vsel %vm219_vm1, %v836_v34, -1e+30  ;;  %v852_v37 = vpop.f32.mrb[0].mxu1  ;;  %v340_v38 = vpop.f32.mrb[1].mxu0 }
 0x10e   : > { %v583_v39 = vmul.f32 %v852_v37, %v797_v26  ;;  %v612_v40 = vsel %vm219_vm1, %v852_v37, -1e+30  ;;  %v371_v41 = vmul.f32 %v793_v28, %v340_v38  ;;  %v550_v42 = vpop.f32.mrb[1].mxu1  ;;  %v837_v43 = vpop.f32.mrb[2].mxu0  ;;  %v401_v45 = vsel %vm217_vm3, %v340_v38, -1e+30 }
 0x10f   : > { %v581_v46 = vmul.f32 %v793_v28, %v550_v42  ;;  %v853_v47 = vpop.f32.mrb[2].mxu1  ;;  %v343_v48 = vpop.f32.mrb[3].mxu0  ;;  %v383_v50 = vsel %vm379_vm2, %v373_v35, 0.0  ;;  %v1127_v51 = vsel %vm379_vm2, %v403_v36, -inf  ;;  %v1130_v52 = vsel %vm379_vm2, %v612_v40, -inf }
 0x110   : > { %v610_v53 = vsel %vm217_vm3, %v550_v42, -1e+30  ;;  %v553_v54 = vpop.f32.mrb[3].mxu1  ;;  %v592_v55 = vsel %vm379_vm2, %v583_v39, 0.0  ;;  %v380_v56 = vsel %vm379_vm2, %v371_v41, 0.0  ;;  %v374_v57 = vmul.f32 %v837_v43, %v798_v29 }
 0x111   : > { %v404_v58 = vsel %vm220_vm4, %v837_v43, -1e+30  ;;  %v1137_v59 = vsel %vm379_vm2, %v401_v45, -inf  ;;  %v584_v60 = vmul.f32 %v853_v47, %v798_v29  ;;  %v613_v61 = vsel %vm220_vm4, %v853_v47, -1e+30 }
 0x112   : > { %v372_v62 = vmul.f32 %v1111_v31, %v343_v48  ;;  %v589_v63 = vsel %vm379_vm2, %v581_v46, 0.0  ;;  %v1144_v0 = vsel %vm379_vm2, %v610_v53, -inf  ;;  %v402_v1 = vsel %vm218_vm5, %v343_v48, -1e+30 }
 0x113   : > { %v582_v2 = vmul.f32 %v1111_v31, %v553_v54  ;;  %v385_v3 = vsel %vm379_vm2, %v374_v57, 0.0  ;;  %v412_v4 = vsel %vm379_vm2, %v404_v58, -inf  ;;  %v621_v5 = vsel %vm379_vm2, %v613_v61, -inf }
 0x114   : > { %v381_v6 = vsel %vm379_vm2, %v372_v62, 0.0  ;;  %v840_v7 = vpop.f32.mrb[4].mxu0  ;;  %v594_v8 = vsel %vm379_vm2, %v584_v60, 0.0  ;;  %v410_v10 = vsel %vm379_vm2, %v402_v1, -inf  ;;  %v611_v20 = vsel %vm218_vm5, %v553_v54, -1e+30 }
 0x115   : > { %v382_v9 = vadd.f32 %v381_v6, %v380_v56  ;;  %v590_v11 = vsel %vm379_vm2, %v582_v2, 0.0  ;;  %v856_v12 = vpop.f32.mrb[4].mxu1  ;;  %v356_v13 = vpop.f32.mrb[5].mxu0  ;;  %v407_v15 = vsel %vm223_vm6, %v840_v7, -1e+30  ;;  %v377_v26 = vmul.f32 %v840_v7, %v1113_v32 }
 0x116   : > { %v591_v14 = vadd.f32 %v590_v11, %v589_v63  ;;  %v616_v16 = vsel %vm223_vm6, %v856_v12, -1e+30  ;;  %v566_v17 = vpop.f32.mrb[5].mxu1  ;;  %v841_v18 = vpop.f32.mrb[6].mxu0  ;;  %v417_v21 = vsel %vm379_vm2, %v407_v15, -inf  ;;  %v375_v30 = vmul.f32 %v1115_v33, %v356_v13 }
 0x117   : > { %v384_v19 = vadd.f32 %v383_v50, %v382_v9  ;;  %v626_v22 = vsel %vm379_vm2, %v616_v16, -inf  ;;  %v857_v23 = vpop.f32.mrb[6].mxu1  ;;  %v359_v24 = vpop.f32.mrb[7].mxu0  ;;  %v418_v27 = vmax.f32 %v1127_v51, %v417_v21  ;;  %v405_v31 = vsel %vm221_vm7, %v356_v13, -1e+30 }
 0x118   : > { %v593_v25 = vadd.f32 %v592_v55, %v591_v14  ;;  %v627_v28 = vmax.f32 %v1130_v52, %v626_v22  ;;  %v569_v29 = vpop.f32.mrb[7].mxu1  ;;  %v585_v35 = vmul.f32 %v1115_v33, %v566_v17  ;;  %v587_v36 = vmul.f32 %v856_v12, %v1113_v32 }
 0x119   : > { %v386_v34 = vadd.f32 %v385_v3, %v384_v19  ;;  %v413_v37 = vsel %vm379_vm2, %v405_v31, -inf  ;;  %v614_v39 = vsel %vm221_vm7, %v566_v17, -1e+30  ;;  %v387_v40 = vsel %vm379_vm2, %v375_v30, 0.0 }
 0x11a   : > { %v595_v38 = vadd.f32 %v594_v8, %v593_v25  ;;  %v414_v41 = vmax.f32 %v1137_v59, %v413_v37  ;;  %v596_v42 = vsel %vm379_vm2, %v585_v35, 0.0  ;;  %v622_v43 = vsel %vm379_vm2, %v614_v39, -inf }
 0x11b   : > { %v391_v45 = vsel %vm379_vm2, %v377_v26, 0.0  ;;  %v388_v46 = vadd.f32 %v387_v40, %v386_v34  ;;  %v623_v32 = vmax.f32 %v1144_v0, %v622_v43  ;;  %v378_v48 = vmul.f32 %v841_v18, %v1119_v44 }
 0x11c   : > { %v597_v47 = vadd.f32 %v596_v42, %v595_v38  ;;  %v408_v33 = vsel %vm224_vm8, %v841_v18, -1e+30  ;;  %v617_v50 = vsel %vm224_vm8, %v857_v23, -1e+30  ;;  %v376_v51 = vmul.f32 %v1123_v49, %v359_v24 }
 0x11d   : > { %v419_v52 = vsel %vm379_vm2, %v408_v33, -inf  ;;  %v628_v53 = vsel %vm379_vm2, %v617_v50, -inf  ;;  %v406_v54 = vsel %vm222_vm9, %v359_v24, -1e+30  ;;  %v586_v55 = vmul.f32 %v1123_v49, %v569_v29 }
 0x11e   : > { %v420_v56 = vmax.f32 %v412_v4, %v419_v52  ;;  %v588_v57 = vmul.f32 %v857_v23, %v1119_v44  ;;  %v629_v58 = vmax.f32 %v621_v5, %v628_v53  ;;  %v389_v59 = vsel %vm379_vm2, %v376_v51, 0.0 }
 0x11f   : > { %v390_v60 = vadd.f32 %v389_v59, %v388_v46  ;;  %v415_v61 = vsel %vm379_vm2, %v406_v54, -inf  ;;  %v598_v62 = vsel %vm379_vm2, %v586_v55, 0.0  ;;  %v615_v63 = vsel %vm222_vm9, %v569_v29, -1e+30 }
 0x120   : > { %v422_v0 = vmax.f32 %v418_v27, %v420_v56  ;;  %v631_v1 = vmax.f32 %v627_v28, %v629_v58  ;;  %v416_v2 = vmax.f32 %v410_v10, %v415_v61  ;;  %v599_v3 = vadd.f32 %v598_v62, %v597_v47 }
 0x121   : > { %v619_v6 = vsel %vm379_vm2, %v611_v20, -inf  ;;  %v600_v4 = vsel %vm379_vm2, %v587_v36, 0.0  ;;  %v392_v44 = vadd.f32 %v391_v45, %v390_v60  ;;  %v624_v5 = vsel %vm379_vm2, %v615_v63, -inf }
 0x122   : > { %v393_v7 = vsel %vm379_vm2, %v378_v48, 0.0  ;;  %v421_v8 = vmax.f32 %v414_v41, %v416_v2  ;;  %v601_v9 = vadd.f32 %v600_v4, %v599_v3  ;;  %v625_v11 = vmax.f32 %v619_v6, %v624_v5 }
 0x123   : > { %v602_v49 = vsel %vm379_vm2, %v588_v57, 0.0  ;;  %v394_v12 = vadd.f32 %v393_v7, %v392_v44 }
 0x124   : > { %v423_v13 = vmax.f32 %v421_v8, %v422_v0  ;;  %v603_v10 = vadd.f32 %v602_v49, %v601_v9  ;;  %v630_v14 = vmax.f32 %v623_v32, %v625_v11 }
 0x125   : > { %v395_v15 = vrot.slane %v394_v12, 4 }
 0x126   : > { %v424_v16 = vrot.slane %v423_v13, 4  ;;  %v604_v17 = vrot.slane %v603_v10, 4  ;;  %v632_v18 = vmax.f32 %v630_v14, %v631_v1 }
 0x127   : > { %v396_v19 = vadd.f32 %v395_v15, %v394_v12 }
 0x128   : > { %v425_v20 = vmax.f32 %v423_v13, %v424_v16  ;;  %v605_v21 = vadd.f32 %v604_v17, %v603_v10  ;;  %v633_v22 = vrot.slane %v632_v18, 4 }
 0x129   : > { %v397_v23 = vrot.slane %v396_v19, 2 }
 0x12a   : > { %v426_v24 = vrot.slane %v425_v20, 2  ;;  %v606_v25 = vrot.slane %v605_v21, 2  ;;  %v634_v26 = vmax.f32 %v632_v18, %v633_v22 }
 0x12b   : > { %v398_v27 = vadd.f32 %v397_v23, %v396_v19 }
 0x12c   : > { %v427_v28 = vmax.f32 %v425_v20, %v426_v24  ;;  %v607_v29 = vadd.f32 %v606_v25, %v605_v21  ;;  %v635_v30 = vrot.slane %v634_v26, 2 }
 0x12d   : > { %v399_v34 = vrot.slane %v398_v27, 1 }
 0x12e   : > { %v428_v31 = vrot.slane %v427_v28, 1  ;;  %v608_v35 = vrot.slane %v607_v29, 1  ;;  %v636_v36 = vmax.f32 %v634_v26, %v635_v30 }
 0x12f   : > { %v400_v37 = vadd.f32 %v399_v34, %v398_v27 }
 0x130   : > { %v609_v38 = vadd.f32 %v608_v35, %v607_v29  ;;  %v637_v39 = vrot.slane %v636_v36, 1  ;;  %v429_v40 = vmax.f32 %v427_v28, %v428_v31 }
 0x131   : > { %v430_v41 = vmul.f32 0.015625, %v400_v37 }
 0x132   : > { %v638_v42 = vmax.f32 %v636_v36, %v637_v39  ;;  %v639_v43 = vmul.f32 0.015625, %v609_v38 }
 0x133   : > { %v431_v45 = vsub.f32 %v429_v40, %v430_v41 }
 0x134   : > { %v640_v46 = vsub.f32 %v638_v42, %v639_v43 }
 0x135   : > { %433 = vst.msk [vmem:[%s184_s25] sm:$0x1] %vm432_vm10, %v431_v45 }
 0x136   : > { %782 = vst.msk [vmem:[%s184_s25 + $0x1] sm:$0x1] %vm432_vm10, %v640_v46 }
 0x137   : > { %936 = shalt.err (!%p933_p3)
}
 0x138   : > { %s937_s7 = scalar_lea.hbm %s1211_s29, 32  ;;  %s941_s10 = scalar_lea.hbm %s1261_s3, 64 }
 0x139   : > { %p938_p4 = scmp.ne.s32.totalorder %s1211_s29, %s937_s7  ;;  %p942_p9 = scmp.lt.u32.totalorder %s1211_s29, %s1261_s3 }
 0x13a   : > { %p943_p10 = scmp.lt.u32.totalorder %s941_s10, %s937_s7  ;;  %p945_p12 = scmp.lt.u32.totalorder %s937_s7, %s1211_s29 }
 0x13b   : > { %p939_p7 = pnand %p938_p4, %p1048_p5 }
 0x13c   : > { %p944_p11 = por %p943_p10, %p942_p9 }
 0x13d   : > { %p940_p8 = pneg %p939_p7 }
 0x13e   : > { %p946_p13 = por %p945_p12, %p944_p11 }
 0x140   : > { %p947_p0 = pnand %p946_p13, %p940_p8 }
 0x142   : > { %950 = shalt.err (!%p947_p0)
}
 0x143   : > { %s988_s19 = smov 16   ;;  %s989_s20 = smov 1  }
 0x144   : > { %866 = dma.vmem_to_hbm [thread:$0]  (%p1048_p5), %s1213_s26, 32, %s1211_s29, %s1217_s16, %s988_s19, %s988_s19, %s989_s20  }
 0x145 PF: > { %p872_p1 = scmp.ge.s32.totalorder %s985_s15, 2  ;;  %s672_s24 = sand.u32 1, %s973_s12  }
 0x146   : > { %s673_s25 = scalar_lea.sflag [#allocation3], %s672_s24 }
 0x147   : > { %p869_p2 = pnand %p872_p1, %p1052_p6 }
 0x149   : > { %968 = dma.done.wait (!%p869_p2), %s673_s25, 32  }
 0x14a   : > { %970 = vsyncadd (!%p869_p2), %s673_s25, 4294967264  ;;  %p13_p3 = scmp.ge.s32.totalorder %s1035_s18, 4   ;;  %s1264_s12 = smov %s977_s13 }
 0x14b   : > { %s1265_s13 = smov %s981_s14  ;;  %s1266_s14 = smov %s1046_s21 }
 0x14c   : > { %s1267_s15 = smov %s1035_s18  ;;  %15 = sbr.rel (!%p13_p3) target bundleno = 3 (0x3), region = 73 }
 0x153   :  { %678 = vsyncpa [#allocation3], 1 }
 0x154   :  { %680 = vsyncpa [#allocation3 + $0x1], 1 }

</bundles_post_ra>
